<compile_context>
chip_gen: v6e
topology: v6e:2x2x1
jax: 0.10.0
libtpu: 0.0.40
codegen_flags: <defaults>
</compile_context>

<pallas_src>
import functools

import jax
import jax.numpy as jnp
from jax import lax
from jax.experimental import pallas as pl
from jax.experimental.pallas import tpu as pltpu


def _maxpool_nms_kernel(x_ref, o_ref, *, k, W):
    x = x_ref[...]                      # (TB, H*W)  -- TB images, flattened
    HW = x.shape[1]
    p = (k - 1) // 2

    # Boundary-mask index planes built once at (1, HW): identical across the
    # sublane (image) axis, so the iota / mod / compares cost ~1/TB of the
    # full-block version and keep no block-sized int32 temporaries live.
    lane = lax.broadcasted_iota(jnp.int32, (1, HW), 1)   # flat index in image
    wpos = lane % W                                      # column index in image

    # NOTE: for k > 3 a log-step cascade (roll by 1, 2, 4, ...) would cut the
    # XLU/VPU work to O(log k); k == 3 only needs two shifts per pass.
    shifts = [s for s in range(-p, p + 1) if s != 0]

    # Pass 1: max along W. r[i] = x[i - s]; only valid when the source column
    # stays inside the same image row (masked otherwise, which matches
    # max_pool2d ignoring padded positions since x itself is always in the
    # window).
    row_max = x
    for s in shifts:
        r = pltpu.roll(x, shift=s % HW, axis=1)
        m = (wpos >= s) if s > 0 else (wpos < W + s)     # (1, HW) mask
        row_max = jnp.maximum(row_max, jnp.where(m, r, row_max))

    # Pass 2: max along H == roll by s*W along the flat axis; only valid when
    # the source row stays inside the image.
    hmax = row_max
    for s in shifts:
        r = pltpu.roll(row_max, shift=(s * W) % HW, axis=1)
        m = (lane >= s * W) if s > 0 else (lane < HW + s * W)
        hmax = jnp.maximum(hmax, jnp.where(m, r, hmax))

    # Exact PyTorch semantics (keep may be negative when x << hmax).
    keep = jnp.floor(x - hmax + jnp.asarray(1, x.dtype))
    o_ref[...] = x * keep


def maxpool_nms(x, kernel=3):
    """MaxPoolNms forward. x: (N, C, H, W) float array (NCHW)."""
    # Same-size output (and hence x * keep) only makes sense for odd kernels,
    # matching the PyTorch module's implicit requirement.
    assert kernel % 2 == 1, "MaxPoolNms requires an odd kernel size"

    N, C, H, W = x.shape
    NC, HW = N * C, H * W
    xr = x.reshape(NC, HW)              # lane-dense: full H*W on the lane axis

    itemsize = jnp.dtype(x.dtype).itemsize
    row_bytes = HW * itemsize

    # Dtype-aware sublane packing: f32 -> 8 rows, bf16 -> 16, int8/fp8 -> 32.
    sublane = max(8, 32 // itemsize)

    # Generation-aware VMEM budget (v5e/v6e: 128 MiB physical, v7x: 64 MiB).
    try:
        vmem_cap = int(pltpu.get_tpu_info().vmem_capacity_bytes)
    except Exception:
        vmem_cap = 64 << 20             # conservative fallback (v7x-sized)

    # Target I/O tile: 4 MiB on 128 MiB-VMEM chips (HBM-bound v5e/v6e), 2 MiB
    # on 64 MiB chips (v7x). Cap so ~4 double-buffered I/O tiles plus ~6 live
    # block-sized temporaries fit the physical budget with headroom.
    target_tile_bytes = (4 << 20) if vmem_cap >= (96 << 20) else (2 << 20)
    max_tile_bytes = max(row_bytes * sublane,
                         min(target_tile_bytes, (vmem_cap - (8 << 20)) // 10))
    max_rows = max(sublane, (max_tile_bytes // row_bytes // sublane) * sublane)

    # Pick TB: multiple of `sublane`, at most `max_rows`, preferably dividing
    # NC (no partial tail block / masked writeback DMA) and leaving >= 2 grid
    # steps so dimension_semantics=("parallel",) can shard across v7x's 2 TCs.
    if NC <= sublane:
        tb = NC
    else:
        cap = min(max_rows, NC)
        if NC >= 2 * sublane:
            cap = min(cap, max(sublane, (NC // 2 // sublane) * sublane))
        cap = max(sublane, (cap // sublane) * sublane)
        tb = None
        for t in range(cap, 0, -sublane):
            if NC % t == 0:
                tb = t
                break
        if tb is None:
            tb = cap
    grid = (pl.cdiv(NC, tb),)

    # Scoped-VMEM limit: above v5e's 16 MiB default so pipelining is not
    # throttled, but never above the chip's physical capacity minus headroom.
    tile_bytes = tb * row_bytes
    vmem_limit = int(max(16 << 20,
                         min(max(32 << 20, 8 * tile_bytes + (4 << 20)),
                             vmem_cap - (4 << 20))))

    out = pl.pallas_call(
        functools.partial(_maxpool_nms_kernel, k=kernel, W=W),
        out_shape=jax.ShapeDtypeStruct((NC, HW), x.dtype),
        grid=grid,
        in_specs=[pl.BlockSpec((tb, HW), lambda i: (i, 0))],
        out_specs=pl.BlockSpec((tb, HW), lambda i: (i, 0)),
        compiler_params=pltpu.CompilerParams(
            dimension_semantics=("parallel",),
            vmem_limit_bytes=vmem_limit),
    )(xr)

    return out.reshape(N, C, H, W)


def _reference(x, kernel=3):
    """Pure-JAX reference (matches F.max_pool2d(k, stride=1, same padding))."""
    p = (kernel - 1) // 2
    hmax = lax.reduce_window(
        x, -jnp.inf, lax.max,
        window_dimensions=(1, 1, kernel, kernel),
        window_strides=(1, 1, 1, 1),
        padding=((0, 0), (0, 0), (p, p), (p, p)))
    keep = jnp.floor(x - hmax + 1.0)
    return x * keep


if __name__ == "__main__":
    key = jax.random.PRNGKey(0)

    # Primary test: module-default kernel=3, small NCHW input.
    x = jax.random.normal(key, (2, 4, 16, 16), dtype=jnp.float32)
    out = jax.block_until_ready(maxpool_nms(x, kernel=3))
    ref = _reference(x, kernel=3)
    assert out.shape == ref.shape and out.dtype == ref.dtype
    assert jnp.allclose(out, ref, atol=1e-6, rtol=1e-6), "mismatch vs reference"

    # Secondary test: N*C not divisible by the sublane-rounded block (tail
    # block path) to exercise masked/clamped writeback on the last grid step.
    x2 = jax.random.normal(jax.random.PRNGKey(1), (3, 5, 16, 16), dtype=jnp.float32)
    out2 = jax.block_until_ready(maxpool_nms(x2, kernel=3))
    ref2 = _reference(x2, kernel=3)
    assert jnp.allclose(out2, ref2, atol=1e-6, rtol=1e-6), "tail-block mismatch"

    print("KERNEL_OK")
</pallas_src>

<mosaic_0001>
module attributes {stable_mosaic.version = 11 : i64} {
  func.func @_maxpool_nms_kernel(%arg0: i32, %arg1: memref<8x256xf32, #tpu.memory_space<vmem>>, %arg2: memref<8x256xf32, #tpu.memory_space<vmem>>) attributes {dimension_semantics = [#tpu.dimension_semantics<parallel>], iteration_bounds = array<i64: 1>, scalar_prefetch = 0 : i64, scratch_operands = 0 : i64, tpu.core_type = #tpu.core_type<tc>, window_params = [{transform_indices = @transform_0, window_bounds = array<i64: 8, 256>}, {transform_indices = @transform_1, window_bounds = array<i64: 8, 256>}]} {
    %c0 = arith.constant 0 : index
    %c0_0 = arith.constant 0 : index
    %0 = vector.load %arg1[%c0, %c0_0] : memref<8x256xf32, #tpu.memory_space<vmem>>, vector<8x256xf32>
    %1 = tpu.iota {dimensions = array<i32: 1>} : vector<1x256xi32>
    %c16_i32 = arith.constant 16 : i32
    %c0_i32 = arith.constant 0 : i32
    %2 = arith.cmpi eq, %c16_i32, %c0_i32 : i32
    %c1_i32 = arith.constant 1 : i32
    %3 = arith.select %2, %c1_i32, %c16_i32 : i32
    %4 = vector.broadcast %3 : i32 to vector<1x256xi32>
    %5 = arith.remsi %1, %4 : vector<1x256xi32>
    %c0_i32_1 = arith.constant 0 : i32
    %6 = vector.broadcast %c0_i32_1 : i32 to vector<1x256xi32>
    %7 = arith.cmpi ne, %5, %6 : vector<1x256xi32>
    %c0_i32_2 = arith.constant 0 : i32
    %8 = vector.broadcast %c0_i32_2 : i32 to vector<1x256xi32>
    %9 = arith.cmpi slt, %5, %8 : vector<1x256xi32>
    %c0_i32_3 = arith.constant 0 : i32
    %10 = arith.cmpi slt, %3, %c0_i32_3 : i32
    %11 = vector.broadcast %10 : i1 to vector<1x256xi1>
    %12 = vector.broadcast %11 : vector<1x256xi1> to vector<1x256xi1>
    %13 = arith.xori %9, %12 : vector<1x256xi1>
    %14 = arith.andi %13, %7 : vector<1x256xi1>
    %15 = vector.broadcast %3 : i32 to vector<1x256xi32>
    %16 = arith.addi %5, %15 : vector<1x256xi32>
    %17 = arith.select %14, %16, %5 : vector<1x256xi1>, vector<1x256xi32>
    %c255_i32 = arith.constant 255 : i32
    %18 = tpu.dynamic_rotate %0 by %c255_i32 dim 1 : vector<8x256xf32>, i32 -> vector<8x256xf32>
    %c15_i32 = arith.constant 15 : i32
    %19 = vector.broadcast %c15_i32 : i32 to vector<1x256xi32>
    %20 = arith.cmpi slt, %17, %19 : vector<1x256xi32>
    %21 = vector.shape_cast %20 : vector<1x256xi1> to vector<1x256xi1>
    %22 = vector.broadcast %21 : vector<1x256xi1> to vector<8x256xi1>
    %23 = arith.select %22, %18, %0 : vector<8x256xi1>, vector<8x256xf32>
    %24 = arith.maximumf %0, %23 : vector<8x256xf32>
    %c1_i32_4 = arith.constant 1 : i32
    %25 = tpu.dynamic_rotate %0 by %c1_i32_4 dim 1 : vector<8x256xf32>, i32 -> vector<8x256xf32>
    %c1_i32_5 = arith.constant 1 : i32
    %26 = vector.broadcast %c1_i32_5 : i32 to vector<1x256xi32>
    %27 = arith.cmpi sge, %17, %26 : vector<1x256xi32>
    %28 = vector.shape_cast %27 : vector<1x256xi1> to vector<1x256xi1>
    %29 = vector.broadcast %28 : vector<1x256xi1> to vector<8x256xi1>
    %30 = arith.select %29, %25, %24 : vector<8x256xi1>, vector<8x256xf32>
    %31 = arith.maximumf %24, %30 : vector<8x256xf32>
    %c240_i32 = arith.constant 240 : i32
    %32 = tpu.dynamic_rotate %31 by %c240_i32 dim 1 : vector<8x256xf32>, i32 -> vector<8x256xf32>
    %c240_i32_6 = arith.constant 240 : i32
    %33 = vector.broadcast %c240_i32_6 : i32 to vector<1x256xi32>
    %34 = arith.cmpi slt, %1, %33 : vector<1x256xi32>
    %35 = vector.shape_cast %34 : vector<1x256xi1> to vector<1x256xi1>
    %36 = vector.broadcast %35 : vector<1x256xi1> to vector<8x256xi1>
    %37 = arith.select %36, %32, %31 : vector<8x256xi1>, vector<8x256xf32>
    %38 = arith.maximumf %31, %37 : vector<8x256xf32>
    %c16_i32_7 = arith.constant 16 : i32
    %39 = tpu.dynamic_rotate %31 by %c16_i32_7 dim 1 : vector<8x256xf32>, i32 -> vector<8x256xf32>
    %c16_i32_8 = arith.constant 16 : i32
    %40 = vector.broadcast %c16_i32_8 : i32 to vector<1x256xi32>
    %41 = arith.cmpi sge, %1, %40 : vector<1x256xi32>
    %42 = vector.shape_cast %41 : vector<1x256xi1> to vector<1x256xi1>
    %43 = vector.broadcast %42 : vector<1x256xi1> to vector<8x256xi1>
    %44 = arith.select %43, %39, %38 : vector<8x256xi1>, vector<8x256xf32>
    %45 = arith.maximumf %38, %44 : vector<8x256xf32>
    %46 = arith.subf %0, %45 : vector<8x256xf32>
    %cst = arith.constant 1.000000e+00 : f32
    %47 = vector.broadcast %cst : f32 to vector<8x256xf32>
    %48 = arith.addf %46, %47 : vector<8x256xf32>
    %49 = math.floor %48 : vector<8x256xf32>
    %50 = arith.mulf %0, %49 : vector<8x256xf32>
    %c0_9 = arith.constant 0 : index
    %c0_10 = arith.constant 0 : index
    %51 = vector.load %arg2[%c0_9, %c0_10] : memref<8x256xf32, #tpu.memory_space<vmem>>, vector<8x256xf32>
    tpu.vector_store %arg2[%c0_9, %c0_10], %50 {strides = array<i32>} : memref<8x256xf32, #tpu.memory_space<vmem>>, vector<8x256xf32>,
    return
  }
  func.func @transform_0(%arg0: i32) -> (i32, i32) {
    %c0_i32 = arith.constant 0 : i32
    %c0_i32_0 = arith.constant 0 : i32
    return %arg0, %c0_i32 : i32, i32
  }
  func.func @transform_1(%arg0: i32) -> (i32, i32) {
    %c0_i32 = arith.constant 0 : i32
    %c0_i32_0 = arith.constant 0 : i32
    return %arg0, %c0_i32 : i32, i32
  }
}

</mosaic_0001>

<bundles_post_ra>
// kernel: tpu_custom_call.1
= control target key start
LH: loop header
LB: loop body
LE: loop exit
PB: predicated region body
PF: predicated region fallthrough
CT: control target
= control target key end

     0   :  { %6 = vsyncpa [#allocation3], 0  ;;  %s223_s0 = inlined_call_operand.hbm [shape: f32[8,256], index: 0, kind: input, shape index: {}]   ;;  %s224_s1 = inlined_call_operand.hbm [shape: f32[8,256], index: 1, kind: output, shape index: {}]  }
   0x1   :  { %7 = vsyncpa [#allocation4], 0  ;;  %s193_s6 = smov [#allocation2]  }
   0x2   :  { %s14_s7 = sshll.u32 %s193_s6, 4  ;;  %s15_s7 = int_to_ptr.vmem [resolvable:$true] %s14_s7 }
   0x3   :  { %s157_s8 = scalar_lea.vmem %s15_s7, 256  ;;  %p162_p1 = scmp.lt.s32.totalorder %s15_s7, %s15_s7 }
   0x4   :  { %p158_p0 = scmp.ne.s32.totalorder %s15_s7, %s157_s8  ;;  %p163_p2 = scmp.lt.s32.totalorder %s157_s8, %s157_s8 }
   0x6   :  { %p164_p3 = por %p163_p2, %p162_p1 }
   0x8   :  { %p165_p4 = pnand %p164_p3, %p158_p0 }
   0xa   :  { %168 = shalt.err (!%p165_p4)
}
   0xb   :  { %17 = dma.hbm_to_vmem [thread:$0]  %s223_s0, 256, %s15_s7, [#allocation3]  }
   0xc   :  { %189 = dma.done.wait [#allocation3], 256  }
   0xd   :  { %190 = vsyncadd [#allocation3], 4294967040  ;;  %v212_v0 = vld [vmem:[#allocation2] sm:$0xff]  ;;  %s194_s11 = smov 1   ;;  %s195_s12 = smov 127   ;;  %v22_v1 = vld [vmem:[#allocation2 + $0x8] sm:$0xff]  ;;  %v23_v2 = vlaneseq }
   0xe   :  { %67 = vrot.lane.b32.xlu1 %v212_v0, %s194_s11  ;;  %50 = vrot.lane.b32.xlu0 %v212_v0, %s195_s12  ;;  %s196_s0 = smov 112   ;;  %s197_s13 = smov 16  }
   0xf   :  { %v24_v3 = vand.u32 127, %v23_v2  ;;  %s198_s14 = smov [#allocation5]  }
  0x10   :  { %s134_s15 = sshll.u32 %s198_s14, 4  ;;  %s135_s15 = int_to_ptr.vmem [resolvable:$true] %s134_s15 }
  0x11   :  { %v25_v4 = vadd.s32 128, %v24_v3  ;;  %v30_v5 = vand.u32 15, %v24_v3  ;;  %vm54_vm0 = vcmp.lt.s32.totalorder %v24_v3, 127  ;;  %vm71_vm3 = vcmp.lt.s32.totalorder %v24_v3, 1  ;;  %s169_s16 = scalar_lea.vmem %s135_s15, 256  ;;  %p174_p6 = scmp.lt.s32.totalorder %s135_s15, %s135_s15 }
  0x12   :  { %69 = vrot.lane.b32.xlu1 %v22_v1, %s194_s11  ;;  %52 = vrot.lane.b32.xlu0 %v22_v1, %s195_s12  ;;  %vm88_vm6 = vcmp.lt.s32.totalorder %v24_v3, 112  ;;  %vm105_vm8 = vcmp.lt.s32.totalorder %v24_v3, 16  ;;  %vm108_vm9 = vcmp.ge.s32.totalorder %v24_v3, 16  ;;  %p170_p5 = scmp.ne.s32.totalorder %s135_s15, %s169_s16  ;;  %p175_p7 = scmp.lt.s32.totalorder %s169_s16, %s169_s16 }
  0x13   :  { %v37_v6 = vand.u32 15, %v25_v4  ;;  %vm57_vm1 = vcmp.lt.s32.totalorder %v30_v5, 15  ;;  %vm74_vm5 = vcmp.ge.s32.totalorder %v30_v5, 1  ;;  %vm92_vm7 = vcmp.lt.s32.totalorder %v25_v4, 240 }
  0x14   :  { %p176_p8 = por %p175_p7, %p174_p6 }
  0x15   :  { %vm58_vm2 = vcmp.lt.s32.totalorder %v37_v6, 15  ;;  %vm75_vm4 = vcmp.ge.s32.totalorder %v37_v6, 1 }
  0x16   :  { %p177_p9 = pnand %p176_p8, %p170_p5 }
  0x80   :  { %v68_v7 = vpop.permute.xlu1 %67  ;;  %v51_v8 = vpop.permute.xlu0 %50 }
  0x84   :  { %v53_v9 = vpop.permute.xlu0 %52  ;;  %v70_v10 = vpop.permute.xlu1 %69 }
  0x85   :  { %v55_v11 = vsel %vm54_vm0, %v51_v8, %v53_v9  ;;  %v56_v12 = vsel %vm54_vm0, %v53_v9, %v51_v8  ;;  %v72_v17 = vsel %vm71_vm3, %v68_v7, %v70_v10  ;;  %v73_v18 = vsel %vm71_vm3, %v70_v10, %v68_v7 }
  0x86   :  { %v63_v13 = vsel %vm57_vm1, %v55_v11, %v212_v0  ;;  %v64_v14 = vsel %vm58_vm2, %v56_v12, %v22_v1 }
  0x87   :  { %v65_v15 = vmax.f32 %v212_v0, %v63_v13  ;;  %v66_v16 = vmax.f32 %v22_v1, %v64_v14 }
  0x89   :  { %v81_v19 = vsel %vm75_vm4, %v72_v17, %v66_v16  ;;  %v80_v20 = vsel %vm74_vm5, %v73_v18, %v65_v15 }
  0x8a   :  { %v83_v21 = vmax.f32 %v66_v16, %v81_v19  ;;  %v82_v22 = vmax.f32 %v65_v15, %v80_v20 }
  0x8c   :  { %86 = vrot.lane.b32.xlu1 %v83_v21, %s196_s0  ;;  %84 = vrot.lane.b32.xlu0 %v82_v22, %s196_s0 }
  0x90   :  { %103 = vrot.lane.b32.xlu1 %v83_v21, %s197_s13  ;;  %101 = vrot.lane.b32.xlu0 %v82_v22, %s197_s13 }
  0xfe   :  { %v87_v23 = vpop.permute.xlu1 %86  ;;  %v85_v24 = vpop.permute.xlu0 %84 }
  0xff   :  { %v89_v25 = vsel %vm88_vm6, %v85_v24, %v87_v23  ;;  %v90_v26 = vsel %vm88_vm6, %v87_v23, %v85_v24 }
 0x100   :  { %v98_v27 = vsel %vm92_vm7, %v90_v26, %v83_v21  ;;  %v99_v29 = vmax.f32 %v82_v22, %v89_v25 }
 0x101   :  { %v100_v28 = vmax.f32 %v83_v21, %v98_v27 }
 0x102   :  { %v104_v30 = vpop.permute.xlu1 %103  ;;  %v102_v31 = vpop.permute.xlu0 %101 }
 0x103   :  { %v106_v32 = vsel %vm105_vm8, %v102_v31, %v104_v30  ;;  %v107_v33 = vsel %vm105_vm8, %v104_v30, %v102_v31 }
 0x104   :  { %v114_v34 = vsel %vm108_vm9, %v107_v33, %v99_v29  ;;  %v117_v35 = vmax.f32 %v100_v28, %v106_v32 }
 0x105   :  { %v116_v36 = vmax.f32 %v99_v29, %v114_v34 }
 0x106   :  { %v119_v37 = vsub.f32 %v22_v1, %v117_v35 }
 0x107   :  { %v118_v38 = vsub.f32 %v212_v0, %v116_v36 }
 0x108   :  { %v121_v39 = vadd.f32 1.0, %v119_v37 }
 0x109   :  { %v120_v40 = vadd.f32 1.0, %v118_v38 }
 0x10a   :  { %v123_v41 = vfloor.f32 %v121_v39 }
 0x10b   :  { %v122_v42 = vfloor.f32 %v120_v40 }
 0x10c   :  { %v125_v43 = vmul.f32 %v123_v41, %v22_v1 }
 0x10d   :  { %v124_v44 = vmul.f32 %v122_v42, %v212_v0 }
 0x10e   :  { %127 = vst [vmem:[#allocation5 + $0x8] sm:$0xff] %v125_v43 }
 0x10f   :  { %126 = vst [vmem:[#allocation5] sm:$0xff] %v124_v44 }
 0x110   :  { %180 = shalt.err (!%p177_p9)
}
 0x111   :  { %137 = dma.vmem_to_hbm [thread:$0]  %s135_s15, 256, %s224_s1, [#allocation4]  }
 0x112   :  { %191 = dma.done.wait [#allocation4], 256  }
 0x113   :  { %192 = vsyncadd [#allocation4], 4294967040 }
 0x114   :  { %141 = vsyncpa [#allocation3], 1 }
 0x115   :  { %142 = vsyncpa [#allocation4], 1 }

</bundles_post_ra>
